<compile_context>
chip_gen: v6e
topology: v6e:2x2x1
jax: 0.10.0
libtpu: 0.0.40
codegen_flags: <defaults>
</compile_context>

<pallas_src>
import functools

import jax
import jax.numpy as jnp
from jax import lax
from jax.experimental import pallas as pl
from jax.experimental.pallas import tpu as pltpu


def _gate_kernel(x1_ref, x2_ref, w1_ref, b1_ref, w2_ref, b2_ref, o_ref, *,
                 minus: bool, input_dim: int):
    D = input_dim

    x1 = x1_ref[...]                     # (TB, D) native dtype (MXU lhs)
    x2 = x2_ref[...]                     # (TB, D)
    w1 = w1_ref[...]                     # (D, 2D) PyTorch (out, in) layout

    # cat([x1, x2], -1) @ W1.T == x1 @ W1[:, :D].T + x2 @ W1[:, D:].T
    # Contract x's dim 1 (features) with w1-slice's dim 1 (in_features);
    # the MXU consumes the transposed operand directly, f32 accumulation.
    dn = (((1,), (1,)), ((), ()))
    h = (lax.dot_general(x1, w1[:, :D], dn, preferred_element_type=jnp.float32)
         + lax.dot_general(x2, w1[:, D:], dn, preferred_element_type=jnp.float32)
         + b1_ref[...].astype(jnp.float32))          # (TB, D) f32

    w2 = w2_ref[...].astype(jnp.float32)             # (1, D) lane-dense
    b2 = b2_ref[0]                                   # scalar from SMEM

    x1f = x1.astype(jnp.float32)
    x2f = x2.astype(jnp.float32)

    if minus:
        # gate = sigmoid(h @ w2.T + b2) * 0.2  -> VPU mul + lane reduce
        logits = jnp.sum(h * w2, axis=-1, keepdims=True) + b2      # (TB, 1)
        gate = jax.nn.sigmoid(logits) * 0.2
        out = x1f - gate * x2f
    else:
        # gate = sigmoid(tanh(h) @ w2.T + b2)
        h_act = jnp.tanh(h)
        logits = jnp.sum(h_act * w2, axis=-1, keepdims=True) + b2  # (TB, 1)
        gate = jax.nn.sigmoid(logits)
        out = x2f + gate * (x1f - x2f)    # == gate*x1 + (1-gate)*x2

    o_ref[...] = out.astype(o_ref.dtype)


def gate_layer(x1, x2, w1, b1, w2, b2, *, minus: bool = False,
               block_b: int = 512):
    """Pallas GateLayer forward.

    x1, x2 : (B, D)
    w1     : (D, 2D)  -- PyTorch layout (out_features, in_features)
    b1     : (D,)
    w2     : (1, D)   -- PyTorch layout
    b2     : (1,)
    """
    B, D = x1.shape
    assert w1.shape == (D, 2 * D), w1.shape
    assert w2.shape == (1, D), w2.shape

    # Batch tile: full B for small batches, otherwise a multiple of 8 rows.
    if B <= block_b:
        TB = B
    else:
        TB = max(8, (block_b // 8) * 8)
    grid = (pl.cdiv(B, TB),)

    b1_2d = b1.reshape(1, D)     # lane-dense bias row
    b2_1d = b2.reshape(1)        # scalar -> SMEM

    kernel = functools.partial(_gate_kernel, minus=minus, input_dim=D)

    # Advisory cost estimate for the XLA scheduler.
    itemsize = jnp.dtype(x1.dtype).itemsize
    flops = 2 * B * (2 * D) * D + 8 * B * D          # matmuls + gate/combine
    transcendentals = B * D + B                      # tanh + sigmoid
    bytes_accessed = (3 * B * D * itemsize           # x1, x2, out
                      + (2 * D * D + 2 * D + 1) * 4)  # weights + biases
    cost = pl.CostEstimate(flops=flops, transcendentals=transcendentals,
                           bytes_accessed=bytes_accessed)

    return pl.pallas_call(
        kernel,
        out_shape=jax.ShapeDtypeStruct((B, D), x1.dtype),
        grid=grid,
        in_specs=[
            pl.BlockSpec((TB, D), lambda i: (i, 0)),        # x1  (pipelined)
            pl.BlockSpec((TB, D), lambda i: (i, 0)),        # x2  (pipelined)
            pl.BlockSpec((D, 2 * D), lambda i: (0, 0)),     # w1  (resident)
            pl.BlockSpec((1, D), lambda i: (0, 0)),         # b1  (resident)
            pl.BlockSpec((1, D), lambda i: (0, 0)),         # w2  (resident)
            pl.BlockSpec(memory_space=pltpu.MemorySpace.SMEM),  # b2 scalar
        ],
        out_specs=pl.BlockSpec((TB, D), lambda i: (i, 0)),
        compiler_params=pltpu.CompilerParams(
            dimension_semantics=("parallel",)),
        cost_estimate=cost,
    )(x1, x2, w1, b1_2d, w2, b2_1d)
    # TODO(synk): for very large D (e.g. >= 4096 in f32) add a feature-dim
    # grid axis so the resident (D, 2D) weight block fits v7x's 64 MiB VMEM.


def gate_layer_ref(x1, x2, w1, b1, w2, b2, *, minus: bool = False):
    """Pure-JAX reference matching the PyTorch module exactly."""
    cat = jnp.concatenate([x1, x2], axis=-1)
    h = cat @ w1.T + b1
    if minus:
        gate = jax.nn.sigmoid(h @ w2.T + b2) * 0.2
        return x1 - gate * x2
    gate = jax.nn.sigmoid(jnp.tanh(h) @ w2.T + b2)
    return gate * x1 + (1.0 - gate) * x2


if __name__ == "__main__":
    B, D = 8, 128  # batch, input_dim (lane-dense feature dim)

    key = jax.random.PRNGKey(0)
    k1, k2, k3, k4, k5, k6 = jax.random.split(key, 6)

    x1 = jax.random.normal(k1, (B, D), dtype=jnp.float32)
    x2 = jax.random.normal(k2, (B, D), dtype=jnp.float32)

    # Deterministic params (PyTorch shapes: Linear(2D->D), Linear(D->1)).
    bound1 = 1.0 / jnp.sqrt(2.0 * D)
    w1 = jax.random.uniform(k3, (D, 2 * D), jnp.float32, -bound1, bound1)
    b1 = jax.random.uniform(k4, (D,), jnp.float32, -bound1, bound1)
    bound2 = 1.0 / jnp.sqrt(float(D))
    w2 = jax.random.uniform(k5, (1, D), jnp.float32, -bound2, bound2)
    b2 = jax.random.uniform(k6, (1,), jnp.float32, -bound2, bound2)

    ok = True
    for minus in (False, True):
        out = gate_layer(x1, x2, w1, b1, w2, b2, minus=minus)
        jax.block_until_ready(out)
        ref = gate_layer_ref(x1, x2, w1, b1, w2, b2, minus=minus)
        if not jnp.allclose(out, ref, atol=2e-5, rtol=2e-5):
            ok = False
            print(f"mismatch (minus={minus}): "
                  f"max abs err = {jnp.max(jnp.abs(out - ref))}")

    if ok:
        print("KERNEL_OK")
</pallas_src>

<mosaic_0001>
module attributes {stable_mosaic.version = 11 : i64} {
  func.func @_gate_kernel(%arg0: i32, %arg1: memref<8x128xf32, #tpu.memory_space<vmem>>, %arg2: memref<8x128xf32, #tpu.memory_space<vmem>>, %arg3: memref<128x256xf32, #tpu.memory_space<vmem>>, %arg4: memref<1x128xf32, #tpu.memory_space<vmem>>, %arg5: memref<1x128xf32, #tpu.memory_space<vmem>>, %arg6: memref<1xf32, #tpu.memory_space<smem>>, %arg7: memref<8x128xf32, #tpu.memory_space<vmem>>) attributes {dimension_semantics = [#tpu.dimension_semantics<parallel>], iteration_bounds = array<i64: 1>, scalar_prefetch = 0 : i64, scratch_operands = 0 : i64, tpu.core_type = #tpu.core_type<tc>, window_params = [{transform_indices = @transform_0, window_bounds = array<i64: 8, 128>}, {transform_indices = @transform_1, window_bounds = array<i64: 8, 128>}, {pipeline_mode = #tpu.pipeline_mode<synchronous>, transform_indices = @transform_2, window_bounds = array<i64: 128, 256>}, {pipeline_mode = #tpu.pipeline_mode<synchronous>, transform_indices = @transform_3, window_bounds = array<i64: 1, 128>}, {pipeline_mode = #tpu.pipeline_mode<synchronous>, transform_indices = @transform_4, window_bounds = array<i64: 1, 128>}, {transform_indices = @transform_5, window_bounds = array<i64: 1>}, {transform_indices = @transform_6, window_bounds = array<i64: 8, 128>}]} {
    %c0 = arith.constant 0 : index
    %c0_0 = arith.constant 0 : index
    %0 = vector.load %arg1[%c0, %c0_0] : memref<8x128xf32, #tpu.memory_space<vmem>>, vector<8x128xf32>
    %c0_1 = arith.constant 0 : index
    %c0_2 = arith.constant 0 : index
    %1 = vector.load %arg2[%c0_1, %c0_2] : memref<8x128xf32, #tpu.memory_space<vmem>>, vector<8x128xf32>
    %c0_3 = arith.constant 0 : index
    %c0_4 = arith.constant 0 : index
    %2 = vector.load %arg3[%c0_3, %c0_4] : memref<128x256xf32, #tpu.memory_space<vmem>>, vector<128x256xf32>
    %3 = vector.extract_strided_slice %2 {offsets = [0, 0], sizes = [128, 128], strides = [1, 1]} : vector<128x256xf32> to vector<128x128xf32>
    %cst = arith.constant dense<0.000000e+00> : vector<8x128xf32>
    %4 = tpu.matmul %0, %3, %cst {dimension_numbers = #tpu.dot_dimension_numbers<[1], [1], [0], [0], [0, 0, 1, 0], [], []>} : vector<8x128xf32>, vector<128x128xf32>, vector<8x128xf32> -> vector<8x128xf32>
    %5 = vector.extract_strided_slice %2 {offsets = [0, 128], sizes = [128, 128], strides = [1, 1]} : vector<128x256xf32> to vector<128x128xf32>
    %cst_5 = arith.constant dense<0.000000e+00> : vector<8x128xf32>
    %6 = tpu.matmul %1, %5, %cst_5 {dimension_numbers = #tpu.dot_dimension_numbers<[1], [1], [0], [0], [0, 0, 1, 0], [], []>} : vector<8x128xf32>, vector<128x128xf32>, vector<8x128xf32> -> vector<8x128xf32>
    %7 = arith.addf %4, %6 : vector<8x128xf32>
    %c0_6 = arith.constant 0 : index
    %c0_7 = arith.constant 0 : index
    %8 = vector.load %arg4[%c0_6, %c0_7] : memref<1x128xf32, #tpu.memory_space<vmem>>, vector<1x128xf32>
    %9 = vector.broadcast %8 : vector<1x128xf32> to vector<8x128xf32>
    %10 = arith.addf %7, %9 : vector<8x128xf32>
    %c0_8 = arith.constant 0 : index
    %c0_9 = arith.constant 0 : index
    %11 = vector.load %arg5[%c0_8, %c0_9] : memref<1x128xf32, #tpu.memory_space<vmem>>, vector<1x128xf32>
    %c0_10 = arith.constant 0 : index
    %12 = memref.load %arg6[%c0_10] : memref<1xf32, #tpu.memory_space<smem>>
    %13 = math.tanh %10 : vector<8x128xf32>
    %14 = vector.broadcast %11 : vector<1x128xf32> to vector<8x128xf32>
    %15 = arith.mulf %13, %14 : vector<8x128xf32>
    %cst_11 = arith.constant dense<0.000000e+00> : vector<8xf32>
    %16 = vector.multi_reduction <add>, %15, %cst_11 [1] : vector<8x128xf32> to vector<8xf32>
    %17 = vector.shape_cast %16 : vector<8xf32> to vector<8x1xf32>
    %18 = vector.broadcast %12 : f32 to vector<8x1xf32>
    %19 = arith.addf %17, %18 : vector<8x1xf32>
    %20 = arith.negf %19 : vector<8x1xf32>
    %21 = math.exp %20 : vector<8x1xf32>
    %cst_12 = arith.constant 1.000000e+00 : f32
    %22 = vector.broadcast %cst_12 : f32 to vector<8x1xf32>
    %23 = arith.addf %22, %21 : vector<8x1xf32>
    %24 = arith.divf %22, %23 : vector<8x1xf32>
    %25 = arith.subf %0, %1 : vector<8x128xf32>
    %26 = vector.broadcast %24 : vector<8x1xf32> to vector<8x128xf32>
    %27 = arith.mulf %26, %25 : vector<8x128xf32>
    %28 = arith.addf %1, %27 : vector<8x128xf32>
    %c0_13 = arith.constant 0 : index
    %c0_14 = arith.constant 0 : index
    %29 = vector.load %arg7[%c0_13, %c0_14] : memref<8x128xf32, #tpu.memory_space<vmem>>, vector<8x128xf32>
    tpu.vector_store %arg7[%c0_13, %c0_14], %28 {strides = array<i32>} : memref<8x128xf32, #tpu.memory_space<vmem>>, vector<8x128xf32>,
    return
  }
  func.func @transform_0(%arg0: i32) -> (i32, i32) {
    %c0_i32 = arith.constant 0 : i32
    %c0_i32_0 = arith.constant 0 : i32
    return %arg0, %c0_i32 : i32, i32
  }
  func.func @transform_1(%arg0: i32) -> (i32, i32) {
    %c0_i32 = arith.constant 0 : i32
    %c0_i32_0 = arith.constant 0 : i32
    return %arg0, %c0_i32 : i32, i32
  }
  func.func @transform_2(%arg0: i32) -> (i32, i32) {
    %c0_i32 = arith.constant 0 : i32
    %c0_i32_0 = arith.constant 0 : i32
    %c0_i32_1 = arith.constant 0 : i32
    return %c0_i32, %c0_i32_0 : i32, i32
  }
  func.func @transform_3(%arg0: i32) -> (i32, i32) {
    %c0_i32 = arith.constant 0 : i32
    %c0_i32_0 = arith.constant 0 : i32
    %c0_i32_1 = arith.constant 0 : i32
    return %c0_i32, %c0_i32_0 : i32, i32
  }
  func.func @transform_4(%arg0: i32) -> (i32, i32) {
    %c0_i32 = arith.constant 0 : i32
    %c0_i32_0 = arith.constant 0 : i32
    %c0_i32_1 = arith.constant 0 : i32
    return %c0_i32, %c0_i32_0 : i32, i32
  }
  func.func @transform_5(%arg0: i32) -> i32 {
    %c0_i32 = arith.constant 0 : i32
    %c0_i32_0 = arith.constant 0 : i32
    return %c0_i32 : i32
  }
  func.func @transform_6(%arg0: i32) -> (i32, i32) {
    %c0_i32 = arith.constant 0 : i32
    %c0_i32_0 = arith.constant 0 : i32
    return %arg0, %c0_i32 : i32, i32
  }
}

</mosaic_0001>

<bundles_post_ra>
// kernel: tpu_custom_call.1
= control target key start
LH: loop header
LB: loop body
LE: loop exit
PB: predicated region body
PF: predicated region fallthrough
CT: control target
= control target key end

     0   :  { %12 = vsyncpa [#allocation4], 0  ;;  %s589_s0 = inlined_call_operand.hbm [shape: f32[8,128], index: 0, kind: input, shape index: {}]   ;;  %s590_s1 = inlined_call_operand.hbm [shape: f32[8,128], index: 1, kind: input, shape index: {}]   ;;  %s591_s2 = inlined_call_operand.hbm [shape: f32[128,256], index: 2, kind: input, shape index: {}]   ;;  %s592_s3 = inlined_call_operand.vmem [shape: f32[1,128], index: 3, kind: input, shape index: {}]   ;;  %s593_s4 = inlined_call_operand.vmem [shape: f32[1,128], index: 4, kind: input, shape index: {}]   ;;  %s594_s5 = inlined_call_operand.<no memory space> [shape: f32[1], index: 5, kind: input, shape index: {}]   ;;  %s595_s6 = inlined_call_operand.hbm [shape: f32[8,128], index: 6, kind: output, shape index: {}]  }
   0x1   :  { %13 = vsyncpa [#allocation7], 0 }
   0x2   :  { %14 = vsyncpa [#allocation5], 0  ;;  %s491_s21 = smov [#allocation6]   ;;  %s492_s23 = smov [#allocation3]  }
   0x3   :  { %s31_s22 = sshll.u32 %s491_s21, 4  ;;  %s21_s24 = sshll.u32 %s492_s23, 4  ;;  %s32_s22 = int_to_ptr.vmem [resolvable:$true] %s31_s22  ;;  %s22_s24 = int_to_ptr.vmem [resolvable:$true] %s21_s24 }
   0x4   :  { %s413_s25 = scalar_lea.vmem %s32_s22, 128  ;;  %p418_p1 = scmp.lt.s32.totalorder %s32_s22, %s32_s22 }
   0x5   :  { %p414_p0 = scmp.ne.s32.totalorder %s32_s22, %s413_s25  ;;  %p419_p2 = scmp.lt.s32.totalorder %s413_s25, %s413_s25 }
   0x7   :  { %p420_p3 = por %p419_p2, %p418_p1 }
   0x9   :  { %p421_p4 = pnand %p420_p3, %p414_p0 }
   0xb   :  { %424 = shalt.err (!%p421_p4)
}
   0xc   :  { %34 = dma.hbm_to_vmem [thread:$0]  %s590_s1, 128, %s32_s22, [#allocation7]  }
   0xd   :  { %s433_s28 = scalar_lea.vmem %s22_s24, 128  ;;  %p438_p6 = scmp.lt.s32.totalorder %s22_s24, %s22_s24 }
   0xe   :  { %p434_p5 = scmp.ne.s32.totalorder %s22_s24, %s433_s28  ;;  %p439_p7 = scmp.lt.s32.totalorder %s433_s28, %s433_s28 }
  0x10   :  { %p440_p8 = por %p439_p7, %p438_p6 }
  0x12   :  { %p441_p9 = pnand %p440_p8, %p434_p5 }
  0x14   :  { %444 = shalt.err (!%p441_p9)
}
  0x15   :  { %24 = dma.hbm_to_vmem [thread:$0]  %s589_s0, 128, %s22_s24, [#allocation4]  }
  0x16   :  { %s493_s7 = smov [#allocation8]  }
  0x17   :  { %s40_s8 = sshll.u32 %s493_s7, 4  ;;  %s41_s8 = int_to_ptr.vmem [resolvable:$true] %s40_s8 }
  0x18   :  { %s453_s9 = scalar_lea.vmem %s41_s8, 4096  ;;  %p458_p11 = scmp.lt.s32.totalorder %s41_s8, %s41_s8 }
  0x19   :  { %p454_p10 = scmp.ne.s32.totalorder %s41_s8, %s453_s9  ;;  %p459_p12 = scmp.lt.s32.totalorder %s453_s9, %s453_s9 }
  0x1b   :  { %p460_p13 = por %p459_p12, %p458_p11 }
  0x1d   :  { %p461_p0 = pnand %p460_p13, %p454_p10 }
  0x1f   :  { %464 = shalt.err (!%p461_p0)
}
  0x20   :  { %s494_s1 = smov 256   ;;  %s495_s10 = smov 16  }
  0x21   :  { %46 = dma.hbm_to_vmem [thread:$0]  %s591_s2, 4096, %s41_s8, [#allocation7], %s494_s1, %s494_s1, %s495_s10  }
  0x22   :  { %485 = dma.done.wait [#allocation4], 128  }
  0x23   :  { %486 = vsyncadd [#allocation4], 4294967168 }
  0x24   :  { %487 = dma.done.wait [#allocation7], 4224  }
  0x25   :  { %488 = vsyncadd [#allocation7], 4294963072  ;;  %v496_v0 = vmov 0.0   ;;  %vm497_vm0 = vmmov 0   ;;  %v95_v1 = vld [vmem:[#allocation8 + $0xf8] sm:$0xff]  ;;  %v94_v2 = vld [vmem:[#allocation8 + $0xf0] sm:$0xff]  ;;  %v256_v45 = vstv %s594_s5 }
  0x26   :  { %321 = vmatprep.subr.mxu0 %v496_v0  ;;  %356 = vmatprep.subr.mxu1 %v496_v0  ;;  %v93_v3 = vld [vmem:[#allocation8 + $0xe8] sm:$0xff]  ;;  %v92_v4 = vld [vmem:[#allocation8 + $0xe0] sm:$0xff]  ;;  %v91_v5 = vld [vmem:[#allocation8 + $0xd8] sm:$0xff] }
  0x27   :  { %353 = vmatprep.mubr.msk.f32.mxu0 %vm497_vm0, %v496_v0  ;;  %388 = vmatprep.mubr.msk.f32.mxu1 %vm497_vm0, %v496_v0  ;;  %v90_v6 = vld [vmem:[#allocation8 + $0xd0] sm:$0xff]  ;;  %v89_v7 = vld [vmem:[#allocation8 + $0xc8] sm:$0xff]  ;;  %v88_v8 = vld [vmem:[#allocation8 + $0xc0] sm:$0xff] }
  0x28   :  { %322 = vmatpush3.xpose.msra.mxu0 %v95_v1  ;;  %357 = vmatpush3.xpose.msra.mxu1 %v94_v2  ;;  %v87_v9 = vld [vmem:[#allocation8 + $0xb8] sm:$0xff]  ;;  %v86_v10 = vld [vmem:[#allocation8 + $0xb0] sm:$0xff]  ;;  %v85_v11 = vld [vmem:[#allocation8 + $0xa8] sm:$0xff] }
  0x29   :  { %323 = vmatprep.subr.mxu0 %v496_v0  ;;  %358 = vmatprep.subr.mxu1 %v496_v0  ;;  %v84_v12 = vld [vmem:[#allocation8 + $0xa0] sm:$0xff]  ;;  %v83_v13 = vld [vmem:[#allocation8 + $0x98] sm:$0xff]  ;;  %v82_v14 = vld [vmem:[#allocation8 + $0x90] sm:$0xff] }
  0x2a   :  { %v81_v15 = vld [vmem:[#allocation8 + $0x88] sm:$0xff]  ;;  %v80_v16 = vld [vmem:[#allocation8 + $0x80] sm:$0xff]  ;;  %v79_v17 = vld [vmem:[#allocation8 + $0x78] sm:$0xff] }
  0x2b   :  { %v78_v18 = vld [vmem:[#allocation8 + $0x70] sm:$0xff]  ;;  %v77_v19 = vld [vmem:[#allocation8 + $0x68] sm:$0xff]  ;;  %v76_v20 = vld [vmem:[#allocation8 + $0x60] sm:$0xff] }
  0x2c   :  { %324 = vmatpush3.xpose.msra.mxu0 %v93_v3  ;;  %359 = vmatpush3.xpose.msra.mxu1 %v92_v4  ;;  %v75_v21 = vld [vmem:[#allocation8 + $0x58] sm:$0xff]  ;;  %v74_v22 = vld [vmem:[#allocation8 + $0x50] sm:$0xff]  ;;  %v73_v23 = vld [vmem:[#allocation8 + $0x48] sm:$0xff] }
  0x2d   :  { %325 = vmatprep.subr.mxu0 %v496_v0  ;;  %360 = vmatprep.subr.mxu1 %v496_v0  ;;  %v72_v24 = vld [vmem:[#allocation8 + $0x40] sm:$0xff]  ;;  %v71_v25 = vld [vmem:[#allocation8 + $0x38] sm:$0xff]  ;;  %v70_v26 = vld [vmem:[#allocation8 + $0x30] sm:$0xff] }
  0x2e   :  { %v69_v27 = vld [vmem:[#allocation8 + $0x28] sm:$0xff]  ;;  %v68_v28 = vld [vmem:[#allocation8 + $0x20] sm:$0xff]  ;;  %v67_v29 = vld [vmem:[#allocation8 + $0x18] sm:$0xff] }
  0x2f   :  { %v66_v30 = vld [vmem:[#allocation8 + $0x10] sm:$0xff]  ;;  %v65_v31 = vld [vmem:[#allocation8 + $0x8] sm:$0xff]  ;;  %v64_v32 = vld [vmem:[#allocation8] sm:$0xff] }
  0x30   :  { %326 = vmatpush3.xpose.msra.mxu0 %v91_v5  ;;  %361 = vmatpush3.xpose.msra.mxu1 %v90_v6  ;;  %v63_v33 = vld [vmem:[#allocation6] sm:$0xff]  ;;  %v62_v34 = vld [vmem:[#allocation3] sm:$0xff] }
  0x31   :  { %327 = vmatprep.subr.mxu0 %v496_v0  ;;  %362 = vmatprep.subr.mxu1 %v496_v0  ;;  %v284_v37 = vld [vmem:[%s592_s3] ss:$0 sm:$0xff]  ;;  %v264_v51 = vsub.f32 %v62_v34, %v63_v33  ;;  %s498_s3 = smov [#allocation9]  }
  0x32   :  { %v285_v42 = vld [vmem:[%s593_s4] ss:$0 sm:$0xff]  ;;  %s274_s17 = sshll.u32 %s498_s3, 4  ;;  %s275_s17 = int_to_ptr.vmem [resolvable:$true] %s274_s17 }
  0x33   :  { %s465_s4 = scalar_lea.vmem %s275_s17, 128  ;;  %p470_p2 = scmp.lt.s32.totalorder %s275_s17, %s275_s17 }
  0x34   :  { %328 = vmatpush3.xpose.msra.mxu0 %v89_v7  ;;  %363 = vmatpush3.xpose.msra.mxu1 %v88_v8  ;;  %p466_p1 = scmp.ne.s32.totalorder %s275_s17, %s465_s4  ;;  %p471_p3 = scmp.lt.s32.totalorder %s465_s4, %s465_s4 }
  0x35   :  { %329 = vmatprep.subr.mxu0 %v496_v0  ;;  %364 = vmatprep.subr.mxu1 %v496_v0 }
  0x36   :  { %p472_p4 = por %p471_p3, %p470_p2 }
  0x38   :  { %330 = vmatpush3.xpose.msra.mxu0 %v87_v9  ;;  %365 = vmatpush3.xpose.msra.mxu1 %v86_v10  ;;  %p473_p5 = pnand %p472_p4, %p466_p1 }
  0x39   :  { %331 = vmatprep.subr.mxu0 %v496_v0  ;;  %366 = vmatprep.subr.mxu1 %v496_v0 }
  0x3c   :  { %332 = vmatpush3.xpose.msra.mxu0 %v85_v11  ;;  %367 = vmatpush3.xpose.msra.mxu1 %v84_v12 }
  0x3d   :  { %333 = vmatprep.subr.mxu0 %v496_v0  ;;  %368 = vmatprep.subr.mxu1 %v496_v0 }
  0x40   :  { %334 = vmatpush3.xpose.msra.mxu0 %v83_v13  ;;  %369 = vmatpush3.xpose.msra.mxu1 %v82_v14 }
  0x41   :  { %335 = vmatprep.subr.mxu0 %v496_v0  ;;  %370 = vmatprep.subr.mxu1 %v496_v0 }
  0x44   :  { %336 = vmatpush3.xpose.msra.mxu0 %v81_v15  ;;  %371 = vmatpush3.xpose.msra.mxu1 %v80_v16 }
  0x45   :  { %337 = vmatprep.subr.mxu0 %v496_v0  ;;  %372 = vmatprep.subr.mxu1 %v496_v0 }
  0x48   :  { %338 = vmatpush3.xpose.msra.mxu0 %v79_v17  ;;  %373 = vmatpush3.xpose.msra.mxu1 %v78_v18 }
  0x49   :  { %339 = vmatprep.subr.mxu0 %v496_v0  ;;  %374 = vmatprep.subr.mxu1 %v496_v0 }
  0x4c   :  { %340 = vmatpush3.xpose.msra.mxu0 %v77_v19  ;;  %375 = vmatpush3.xpose.msra.mxu1 %v76_v20 }
  0x4d   :  { %341 = vmatprep.subr.mxu0 %v496_v0  ;;  %376 = vmatprep.subr.mxu1 %v496_v0 }
  0x50   :  { %342 = vmatpush3.xpose.msra.mxu0 %v75_v21  ;;  %377 = vmatpush3.xpose.msra.mxu1 %v74_v22 }
  0x51   :  { %343 = vmatprep.subr.mxu0 %v496_v0  ;;  %378 = vmatprep.subr.mxu1 %v496_v0 }
  0x54   :  { %344 = vmatpush3.xpose.msra.mxu0 %v73_v23  ;;  %379 = vmatpush3.xpose.msra.mxu1 %v72_v24 }
  0x55   :  { %345 = vmatprep.subr.mxu0 %v496_v0  ;;  %380 = vmatprep.subr.mxu1 %v496_v0 }
  0x58   :  { %346 = vmatpush3.xpose.msra.mxu0 %v71_v25  ;;  %381 = vmatpush3.xpose.msra.mxu1 %v70_v26 }
  0x59   :  { %347 = vmatprep.subr.mxu0 %v496_v0  ;;  %382 = vmatprep.subr.mxu1 %v496_v0 }
  0x5c   :  { %348 = vmatpush3.xpose.msra.mxu0 %v69_v27  ;;  %383 = vmatpush3.xpose.msra.mxu1 %v68_v28 }
  0x5d   :  { %349 = vmatprep.subr.mxu0 %v496_v0  ;;  %384 = vmatprep.subr.mxu1 %v496_v0 }
  0x60   :  { %350 = vmatpush3.xpose.msra.mxu0 %v67_v29  ;;  %385 = vmatpush3.xpose.msra.mxu1 %v66_v30 }
  0x61   :  { %351 = vmatprep.subr.mxu0 %v496_v0  ;;  %386 = vmatprep.subr.mxu1 %v496_v0 }
  0x64   :  { %352 = vmatpush3.xpose.msra.mxu0 %v65_v31  ;;  %387 = vmatpush3.xpose.msra.mxu1 %v64_v32 }
  0x67   :  { %354 = vmatmul.mubr.f32.vlgmr.msra.gmra.mxu0 %v63_v33  ;;  %389 = vmatmul.mubr.f32.vlgmr.msra.gmra.mxu1 %v62_v34 }
 0x127   :  { %v162_v35 = vpop.f32.mrf.mxu0  ;;  %v232_v36 = vpop.f32.mrf.mxu1 }
 0x128   :  { %v233_v38 = vadd.f32 %v232_v36, %v162_v35 }
 0x129   :  { %v355_v39 = vpop.f32.mrf.mxu0  ;;  %v390_v40 = vpop.f32.mrf.mxu1 }
 0x12a   :  { %v243_v41 = vadd.f32 %v284_v37, %v233_v38 }
 0x12c   :  { %399 = vtanh.f32 %v243_v41 }
 0x139   :  { %v400_v43 = vpop.eup %399 }
 0x13a   :  { %v253_v44 = vmul.f32 %v400_v43, %v285_v42 }
 0x13c   :  { %254 = vadd.xlane.f32.xlu0 %v253_v44 }
 0x1c5   :  { %v255_v46 = vpop.xlane.xlu0 %254 }
 0x1c6   :  { %v257_v47 = vadd.f32 %v256_v45, %v255_v46 }
 0x1c8   :  { %v286_v48 = vmul.f32 -1.442695, %v257_v47 }
 0x1ca   :  { %401 = vpow2.f32 %v286_v48 }
 0x1d7   :  { %v402_v49 = vpop.eup %401 }
 0x1d8   :  { %v261_v50 = vadd.f32 1.0, %v402_v49 }
 0x1da   :  { %403 = vrcp.f32 %v261_v50 }
 0x1e7   :  { %v404_v52 = vpop.eup %403 }
 0x1e8   :  { %v265_v53 = vmul.f32 %v404_v52, %v264_v51 }
 0x1ea   :  { %v266_v54 = vadd.f32 %v265_v53, %v63_v33 }
 0x1ec   :  { %267 = vst [vmem:[#allocation9] sm:$0xff] %v266_v54 }
 0x1ed   :  { %476 = shalt.err (!%p473_p5)
}
 0x1ee   :  { %277 = dma.vmem_to_hbm [thread:$0]  %s275_s17, 128, %s595_s6, [#allocation5]  }
 0x1ef   :  { %489 = dma.done.wait [#allocation5], 128  }
 0x1f0   :  { %490 = vsyncadd [#allocation5], 4294967168 }
 0x1f1   :  { %281 = vsyncpa [#allocation4], 1 }
 0x1f2   :  { %282 = vsyncpa [#allocation7], 1 }
 0x1f3   :  { %283 = vsyncpa [#allocation5], 1 }

</bundles_post_ra>
